<compile_context>
chip_gen: v7x
topology: tpu7x:2x2x1
jax: 0.10.0
libtpu: 0.0.40
codegen_flags: <defaults>
</compile_context>

<pallas_src>
import functools

import jax
import jax.numpy as jnp
from jax.experimental import pallas as pl
from jax.experimental.pallas import tpu as pltpu

H1_PAD = 128  # fc1 width (50) padded to a full lane width
H2_PAD = 128  # fc2 width (100) padded to a full lane width


def _round_up(n, m):
    return (n + m - 1) // m * m


def _regmodel_kernel(x_ref, w1_ref, b1_ref, w2_ref, b2_ref, a_ref,
                     w3_ref, b3_ref, y_ref):
    cd = w1_ref.dtype
    x = x_ref[...]                                             # (TB, D) compute dtype

    # fc1 + ReLU   (MXU matmul, f32 accumulate; bias/ReLU on the VPU in f32)
    a1 = jnp.dot(x, w1_ref[...], preferred_element_type=jnp.float32) + b1_ref[...]
    h1 = jnp.maximum(a1, 0.0)

    # dropout (eval mode) -> identity

    # fc2 + PReLU (single shared parameter; alpha read from SMEM scalar path)
    a2 = jnp.dot(h1.astype(cd), w2_ref[...],
                 preferred_element_type=jnp.float32) + b2_ref[...]
    alpha = a_ref[0, 0]
    h2 = jnp.where(a2 >= 0.0, a2, alpha * a2)

    # out (padded-100 -> 1); bias is a scalar from SMEM
    y = jnp.dot(h2.astype(cd), w3_ref[...],
                preferred_element_type=jnp.float32) + b3_ref[0, 0]
    y_ref[...] = y.astype(y_ref.dtype)


@functools.partial(jax.jit, static_argnames=("compute_dtype",))
def regmodel_forward(x, w1, b1, w2, b2, prelu_a, w3, b3,
                     compute_dtype=jnp.bfloat16):
    batch, d = x.shape
    cd = compute_dtype
    f32 = jnp.float32
    h1, h2 = w1.shape[1], w2.shape[1]

    # ---- zero-pad hidden widths to 128 lanes (exact for Linear+ReLU/PReLU) ----
    w1p = jnp.zeros((d, H1_PAD), cd).at[:, :h1].set(w1.astype(cd))
    b1p = jnp.zeros((1, H1_PAD), f32).at[:, :h1].set(b1.astype(f32))
    w2p = jnp.zeros((H1_PAD, H2_PAD), cd).at[:h1, :h2].set(w2.astype(cd))
    b2p = jnp.zeros((1, H2_PAD), f32).at[:, :h2].set(b2.astype(f32))
    w3p = jnp.zeros((H2_PAD, 1), cd).at[:h2, :].set(w3.astype(cd))
    b3p = b3.astype(f32).reshape(1, 1)
    ap = prelu_a.astype(f32).reshape(1, 1)

    # ---- pick a batch tile: ~2 MiB x-DMAs, capped, multiple of 16 sublanes ----
    itemsize = jnp.dtype(cd).itemsize
    tb = max(16, min(8192, (2 << 20) // max(1, d * itemsize)))
    tb = (tb // 16) * 16
    if batch <= tb:
        tb = _round_up(batch, 16)
    batch_p = _round_up(batch, tb)

    xp = x.astype(cd)
    if batch_p != batch:
        xp = jnp.pad(xp, ((0, batch_p - batch), (0, 0)))

    resident = lambda shape: pl.BlockSpec(shape, lambda i: (0, 0))
    smem_scalar = pl.BlockSpec((1, 1), lambda i: (0, 0), memory_space=pltpu.SMEM)

    y = pl.pallas_call(
        _regmodel_kernel,
        out_shape=jax.ShapeDtypeStruct((batch_p, 1), f32),
        grid=(batch_p // tb,),
        in_specs=[
            pl.BlockSpec((tb, d), lambda i: (i, 0)),            # x: streamed
            resident((d, H1_PAD)), resident((1, H1_PAD)),       # w1, b1 (resident)
            resident((H1_PAD, H2_PAD)), resident((1, H2_PAD)),  # w2, b2 (resident)
            smem_scalar,                                        # PReLU alpha
            resident((H2_PAD, 1)),                              # w3 (resident)
            smem_scalar,                                        # out bias
        ],
        out_specs=pl.BlockSpec((tb, 1), lambda i: (i, 0)),
        compiler_params=pltpu.CompilerParams(
            dimension_semantics=("parallel",)),                 # 2 TCs on v7x
    )(xp, w1p, b1p, w2p, b2p, ap, w3p, b3p)

    return y[:batch]


def init_params(key, input_size):
    """Deterministic init mimicking PyTorch defaults (uniform +-1/sqrt(fan_in))."""
    def linear(k, fan_in, fan_out):
        kw, kb = jax.random.split(k)
        bound = 1.0 / jnp.sqrt(fan_in)
        w = jax.random.uniform(kw, (fan_in, fan_out), jnp.float32, -bound, bound)
        b = jax.random.uniform(kb, (1, fan_out), jnp.float32, -bound, bound)
        return w, b

    k1, k2, k3 = jax.random.split(key, 3)
    w1, b1 = linear(k1, input_size, 50)
    w2, b2 = linear(k2, 50, 100)
    w3, b3 = linear(k3, 100, 1)
    prelu_a = jnp.full((1, 1), 0.25, jnp.float32)   # nn.PReLU default init
    return w1, b1, w2, b2, prelu_a, w3, b3


def regmodel_reference(x, w1, b1, w2, b2, prelu_a, w3, b3,
                       compute_dtype=jnp.bfloat16):
    """Pure-JAX reference using the same compute-dtype choice as the kernel."""
    cd = compute_dtype
    f32 = jnp.float32
    a1 = jnp.dot(x.astype(cd), w1.astype(cd), preferred_element_type=f32) + b1
    h1 = jnp.maximum(a1, 0.0)
    a2 = jnp.dot(h1.astype(cd), w2.astype(cd), preferred_element_type=f32) + b2
    h2 = jnp.where(a2 >= 0.0, a2, prelu_a[0, 0] * a2)
    return jnp.dot(h2.astype(cd), w3.astype(cd), preferred_element_type=f32) + b3


if __name__ == "__main__":
    input_size = 32
    key = jax.random.PRNGKey(0)
    kx, kp = jax.random.split(key)
    params = init_params(kp, input_size)

    for batch in (8, 200):   # 200 exercises the batch-padding path
        x = jax.random.normal(jax.random.fold_in(kx, batch),
                              (batch, input_size), jnp.float32)
        y = regmodel_forward(x, *params)
        jax.block_until_ready(y)

        y_ref = regmodel_reference(x, *params)
        assert y.shape == (batch, 1)
        err = float(jnp.max(jnp.abs(y - y_ref)))
        assert jnp.allclose(y, y_ref, atol=2e-3, rtol=2e-3), err

    print("KERNEL_OK")
</pallas_src>

<mosaic_0001>
module attributes {stable_mosaic.version = 11 : i64} {
  func.func @_regmodel_kernel(%arg0: i32, %arg1: memref<16x32xbf16, #tpu.memory_space<vmem>>, %arg2: memref<32x128xbf16, #tpu.memory_space<vmem>>, %arg3: memref<1x128xf32, #tpu.memory_space<vmem>>, %arg4: memref<128x128xbf16, #tpu.memory_space<vmem>>, %arg5: memref<1x128xf32, #tpu.memory_space<vmem>>, %arg6: memref<1x1xf32, #tpu.memory_space<smem>>, %arg7: memref<128x1xbf16, #tpu.memory_space<vmem>>, %arg8: memref<1x1xf32, #tpu.memory_space<smem>>, %arg9: memref<16x1xf32, #tpu.memory_space<vmem>>) attributes {dimension_semantics = [#tpu.dimension_semantics<parallel>], iteration_bounds = array<i64: 1>, scalar_prefetch = 0 : i64, scratch_operands = 0 : i64, tpu.core_type = #tpu.core_type<tc>, window_params = [{transform_indices = @transform_0, window_bounds = array<i64: 16, 32>}, {pipeline_mode = #tpu.pipeline_mode<synchronous>, transform_indices = @transform_1, window_bounds = array<i64: 32, 128>}, {pipeline_mode = #tpu.pipeline_mode<synchronous>, transform_indices = @transform_2, window_bounds = array<i64: 1, 128>}, {pipeline_mode = #tpu.pipeline_mode<synchronous>, transform_indices = @transform_3, window_bounds = array<i64: 128, 128>}, {pipeline_mode = #tpu.pipeline_mode<synchronous>, transform_indices = @transform_4, window_bounds = array<i64: 1, 128>}, {transform_indices = @transform_5, window_bounds = array<i64: 1, 1>}, {pipeline_mode = #tpu.pipeline_mode<synchronous>, transform_indices = @transform_6, window_bounds = array<i64: 128, 1>}, {transform_indices = @transform_7, window_bounds = array<i64: 1, 1>}, {transform_indices = @transform_8, window_bounds = array<i64: 16, 1>}]} {
    %c0 = arith.constant 0 : index
    %c0_0 = arith.constant 0 : index
    %0 = vector.load %arg1[%c0, %c0_0] : memref<16x32xbf16, #tpu.memory_space<vmem>>, vector<16x32xbf16>
    %c0_1 = arith.constant 0 : index
    %c0_2 = arith.constant 0 : index
    %1 = vector.load %arg2[%c0_1, %c0_2] : memref<32x128xbf16, #tpu.memory_space<vmem>>, vector<32x128xbf16>
    %cst = arith.constant dense<0.000000e+00> : vector<16x128xf32>
    %2 = tpu.matmul %0, %1, %cst {dimension_numbers = #tpu.dot_dimension_numbers<[1], [0], [0], [1], [0, 0, 1, 1], [], []>} : vector<16x32xbf16>, vector<32x128xbf16>, vector<16x128xf32> -> vector<16x128xf32>
    %c0_3 = arith.constant 0 : index
    %c0_4 = arith.constant 0 : index
    %3 = vector.load %arg3[%c0_3, %c0_4] : memref<1x128xf32, #tpu.memory_space<vmem>>, vector<1x128xf32>
    %4 = vector.broadcast %3 : vector<1x128xf32> to vector<16x128xf32>
    %5 = arith.addf %2, %4 : vector<16x128xf32>
    %cst_5 = arith.constant 0.000000e+00 : f32
    %6 = vector.broadcast %cst_5 : f32 to vector<16x128xf32>
    %7 = arith.maximumf %5, %6 : vector<16x128xf32>
    %8 = arith.truncf %7 : vector<16x128xf32> to vector<16x128xbf16>
    %c0_6 = arith.constant 0 : index
    %c0_7 = arith.constant 0 : index
    %9 = vector.load %arg4[%c0_6, %c0_7] : memref<128x128xbf16, #tpu.memory_space<vmem>>, vector<128x128xbf16>
    %cst_8 = arith.constant dense<0.000000e+00> : vector<16x128xf32>
    %10 = tpu.matmul %8, %9, %cst_8 {dimension_numbers = #tpu.dot_dimension_numbers<[1], [0], [0], [1], [0, 0, 1, 1], [], []>} : vector<16x128xbf16>, vector<128x128xbf16>, vector<16x128xf32> -> vector<16x128xf32>
    %c0_9 = arith.constant 0 : index
    %c0_10 = arith.constant 0 : index
    %11 = vector.load %arg5[%c0_9, %c0_10] : memref<1x128xf32, #tpu.memory_space<vmem>>, vector<1x128xf32>
    %12 = vector.broadcast %11 : vector<1x128xf32> to vector<16x128xf32>
    %13 = arith.addf %10, %12 : vector<16x128xf32>
    %c0_11 = arith.constant 0 : index
    %c0_12 = arith.constant 0 : index
    %14 = memref.load %arg6[%c0_11, %c0_12] : memref<1x1xf32, #tpu.memory_space<smem>>
    %cst_13 = arith.constant 0.000000e+00 : f32
    %15 = vector.broadcast %cst_13 : f32 to vector<16x128xf32>
    %16 = arith.cmpf oge, %13, %15 : vector<16x128xf32>
    %17 = vector.broadcast %14 : f32 to vector<16x128xf32>
    %18 = arith.mulf %17, %13 : vector<16x128xf32>
    %19 = arith.select %16, %13, %18 : vector<16x128xi1>, vector<16x128xf32>
    %20 = arith.truncf %19 : vector<16x128xf32> to vector<16x128xbf16>
    %c0_14 = arith.constant 0 : index
    %c0_15 = arith.constant 0 : index
    %21 = vector.load %arg7[%c0_14, %c0_15] : memref<128x1xbf16, #tpu.memory_space<vmem>>, vector<128x1xbf16>
    %cst_16 = arith.constant dense<0.000000e+00> : vector<16x1xf32>
    %22 = tpu.matmul %20, %21, %cst_16 {dimension_numbers = #tpu.dot_dimension_numbers<[1], [0], [0], [1], [0, 0, 1, 1], [], []>} : vector<16x128xbf16>, vector<128x1xbf16>, vector<16x1xf32> -> vector<16x1xf32>
    %c0_17 = arith.constant 0 : index
    %c0_18 = arith.constant 0 : index
    %23 = memref.load %arg8[%c0_17, %c0_18] : memref<1x1xf32, #tpu.memory_space<smem>>
    %24 = vector.broadcast %23 : f32 to vector<16x1xf32>
    %25 = arith.addf %22, %24 : vector<16x1xf32>
    %c0_19 = arith.constant 0 : index
    %c0_20 = arith.constant 0 : index
    %26 = vector.load %arg9[%c0_19, %c0_20] : memref<16x1xf32, #tpu.memory_space<vmem>>, vector<16x1xf32>
    tpu.vector_store %arg9[%c0_19, %c0_20], %25 {strides = array<i32>} : memref<16x1xf32, #tpu.memory_space<vmem>>, vector<16x1xf32>,
    return
  }
  func.func @transform_0(%arg0: i32) -> (i32, i32) {
    %c0_i32 = arith.constant 0 : i32
    %c0_i32_0 = arith.constant 0 : i32
    return %arg0, %c0_i32 : i32, i32
  }
  func.func @transform_1(%arg0: i32) -> (i32, i32) {
    %c0_i32 = arith.constant 0 : i32
    %c0_i32_0 = arith.constant 0 : i32
    %c0_i32_1 = arith.constant 0 : i32
    return %c0_i32, %c0_i32_0 : i32, i32
  }
  func.func @transform_2(%arg0: i32) -> (i32, i32) {
    %c0_i32 = arith.constant 0 : i32
    %c0_i32_0 = arith.constant 0 : i32
    %c0_i32_1 = arith.constant 0 : i32
    return %c0_i32, %c0_i32_0 : i32, i32
  }
  func.func @transform_3(%arg0: i32) -> (i32, i32) {
    %c0_i32 = arith.constant 0 : i32
    %c0_i32_0 = arith.constant 0 : i32
    %c0_i32_1 = arith.constant 0 : i32
    return %c0_i32, %c0_i32_0 : i32, i32
  }
  func.func @transform_4(%arg0: i32) -> (i32, i32) {
    %c0_i32 = arith.constant 0 : i32
    %c0_i32_0 = arith.constant 0 : i32
    %c0_i32_1 = arith.constant 0 : i32
    return %c0_i32, %c0_i32_0 : i32, i32
  }
  func.func @transform_5(%arg0: i32) -> (i32, i32) {
    %c0_i32 = arith.constant 0 : i32
    %c0_i32_0 = arith.constant 0 : i32
    %c0_i32_1 = arith.constant 0 : i32
    return %c0_i32, %c0_i32_0 : i32, i32
  }
  func.func @transform_6(%arg0: i32) -> (i32, i32) {
    %c0_i32 = arith.constant 0 : i32
    %c0_i32_0 = arith.constant 0 : i32
    %c0_i32_1 = arith.constant 0 : i32
    return %c0_i32, %c0_i32_0 : i32, i32
  }
  func.func @transform_7(%arg0: i32) -> (i32, i32) {
    %c0_i32 = arith.constant 0 : i32
    %c0_i32_0 = arith.constant 0 : i32
    %c0_i32_1 = arith.constant 0 : i32
    return %c0_i32, %c0_i32_0 : i32, i32
  }
  func.func @transform_8(%arg0: i32) -> (i32, i32) {
    %c0_i32 = arith.constant 0 : i32
    %c0_i32_0 = arith.constant 0 : i32
    return %arg0, %c0_i32 : i32, i32
  }
}

</mosaic_0001>

<bundles_post_ra>
// kernel: regmodel_forward.1
= control target key start
LH: loop header
LB: loop body
LE: loop exit
PB: predicated region body
PF: predicated region fallthrough
CT: control target
= control target key end

     0   :  { %v457_v0 = vmov 0.0   ;;  %vm458_vm0 = vmmov 0   ;;  %vm62_vm1 = vcmask 261120   ;;  %vm338_vm4 = vcmask 7168   ;;  %s603_s1 = inlined_call_operand.vmem [shape: bf16[32,128], index: 1, kind: input, shape index: {}]   ;;  %s604_s3 = inlined_call_operand.vmem [shape: bf16[128,128], index: 3, kind: input, shape index: {}]   ;;  %s605_s0 = inlined_call_operand.vmem [shape: bf16[16,32], index: 0, kind: input, shape index: {}]   ;;  %s606_s6 = inlined_call_operand.vmem [shape: bf16[128,1], index: 6, kind: input, shape index: {}]   ;;  %s607_s2 = inlined_call_operand.vmem [shape: f32[1,128], index: 2, kind: input, shape index: {}]   ;;  %s608_s4 = inlined_call_operand.vmem [shape: f32[1,128], index: 4, kind: input, shape index: {}]   ;;  %s609_s5 = inlined_call_operand.<no memory space> [shape: f32[1,1], index: 5, kind: input, shape index: {}]   ;;  %s610_s7 = inlined_call_operand.<no memory space> [shape: f32[1,1], index: 7, kind: input, shape index: {}]   ;;  %s611_s8 = inlined_call_operand.vmem [shape: f32[16,1], index: 8, kind: output, shape index: {}]  }
   0x1   :  { %388 = vmatprep.subr.bf16.mxu0 %v457_v0  ;;  %v438_v1 = vld [vmem:[%s603_s1] sm:$0xff]   ;;  %392 = vmatprep.mubr.msk.bf16.mxu0 %vm458_vm0, %v457_v0  ;;  %v439_v2 = vld [vmem:[%s603_s1 + $0x8] sm:$0xff]   ;;  %v443_v6 = vld [vmem:[%s604_s3 + $0x10] sm:$0xff]   ;;  %v225_v32 = vstv %s609_s5 }
   0x2   :  { %396 = vmatprep.subr.bf16.mxu1 %v457_v0  ;;  %412 = vmatprep.mubr.msk.bf16.mxu1 %vm458_vm0, %v457_v0  ;;  %v441_v3 = vld [vmem:[%s604_s3] sm:$0xff]   ;;  %v442_v5 = vld [vmem:[%s604_s3 + $0x8] sm:$0xff]   ;;  %v444_v7 = vld [vmem:[%s604_s3 + $0x18] sm:$0xff]   ;;  %v248_v43 = vstv %s610_s7 }
   0x3   :  { %389 = vmatpush3.bf16.msra.mxu0 %v438_v1  ;;  %v440_v4 = vld [vmem:[%s605_s0] sm:$0xff]   ;;  %397 = vmatpush3.bf16.msra.mxu1 %v441_v3  ;;  %v446_v9 = vld [vmem:[%s604_s3 + $0x28] sm:$0xff]   ;;  %v447_v10 = vld [vmem:[%s604_s3 + $0x30] sm:$0xff]  }
   0x4   :  { %390 = vmatprep.subr.bf16.mxu0 %v457_v0  ;;  %398 = vmatprep.subr.bf16.mxu1 %v457_v0  ;;  %v445_v8 = vld [vmem:[%s604_s3 + $0x20] sm:$0xff]   ;;  %v448_v11 = vld [vmem:[%s604_s3 + $0x38] sm:$0xff]   ;;  %v450_v13 = vld [vmem:[%s606_s6 + $0x8] sm:$0xff]  }
   0x5   :  { %v449_v12 = vld [vmem:[%s606_s6] sm:$0xff]   ;;  %v451_v14 = vld [vmem:[%s606_s6 + $0x10] sm:$0xff]   ;;  %v452_v15 = vld [vmem:[%s606_s6 + $0x18] sm:$0xff]  }
   0x6   :  { %v453_v16 = vld [vmem:[%s606_s6 + $0x20] sm:$0xff]   ;;  %v454_v17 = vld [vmem:[%s606_s6 + $0x28] sm:$0xff]   ;;  %v455_v28 = vld [vmem:[%s606_s6 + $0x30] sm:$0xff]  }
   0x7   :  { %391 = vmatpush3.bf16.msra.mxu0 %v439_v2  ;;  %399 = vmatpush3.bf16.msra.mxu1 %v442_v5  ;;  %v345_v18 = vld [vmem:[%s607_s2] ss:$0 sm:$0xff]  ;;  %v456_v29 = vld [vmem:[%s606_s6 + $0x38] sm:$0xff]  }
   0x8   :  { %416 = vmatprep.subr.bf16.mxu0 %v457_v0  ;;  %400 = vmatprep.subr.bf16.mxu1 %v457_v0  ;;  %v350_v30 = vld [vmem:[%s608_s4] ss:$0 sm:$0xff] }
   0xa   :  { %393 = vmatmul.mubr.msk.bf16.vlgmr.msra.gmra.mrb[0].mxu0 %vm62_vm1, %v440_v4 }
   0xb   :  { %432 = vmatprep.mubr.msk.bf16.mxu0 %vm458_vm0, %v457_v0  ;;  %401 = vmatpush3.bf16.msra.mxu1 %v443_v6 }
   0xc   :  { %402 = vmatprep.subr.bf16.mxu1 %v457_v0  ;;  %417 = vmatpush3.bf16.msra.mxu0 %v449_v12 }
   0xd   :  { %418 = vmatprep.subr.bf16.mxu0 %v457_v0 }
   0xf   :  { %403 = vmatpush3.bf16.msra.mxu1 %v444_v7 }
  0x10   :  { %404 = vmatprep.subr.bf16.mxu1 %v457_v0  ;;  %419 = vmatpush3.bf16.msra.mxu0 %v450_v13 }
  0x11   :  { %420 = vmatprep.subr.bf16.mxu0 %v457_v0 }
  0x13   :  { %405 = vmatpush3.bf16.msra.mxu1 %v445_v8 }
  0x14   :  { %406 = vmatprep.subr.bf16.mxu1 %v457_v0  ;;  %421 = vmatpush3.bf16.msra.mxu0 %v451_v14 }
  0x15   :  { %422 = vmatprep.subr.bf16.mxu0 %v457_v0 }
  0x17   :  { %407 = vmatpush3.bf16.msra.mxu1 %v446_v9 }
  0x18   :  { %408 = vmatprep.subr.bf16.mxu1 %v457_v0  ;;  %423 = vmatpush3.bf16.msra.mxu0 %v452_v15 }
  0x19   :  { %424 = vmatprep.subr.bf16.mxu0 %v457_v0 }
  0x1b   :  { %409 = vmatpush3.bf16.msra.mxu1 %v447_v10 }
  0x1c   :  { %410 = vmatprep.subr.bf16.mxu1 %v457_v0  ;;  %425 = vmatpush3.bf16.msra.mxu0 %v453_v16 }
  0x1d   :  { %426 = vmatprep.subr.bf16.mxu0 %v457_v0 }
  0x1f   :  { %411 = vmatpush3.bf16.msra.mxu1 %v448_v11 }
  0x20   :  { %427 = vmatpush3.bf16.msra.mxu0 %v454_v17 }
  0x21   :  { %428 = vmatprep.subr.bf16.mxu0 %v457_v0 }
  0x24   :  { %429 = vmatpush3.bf16.msra.mxu0 %v455_v28 }
  0x25   :  { %430 = vmatprep.subr.bf16.mxu0 %v457_v0 }
  0x28   :  { %431 = vmatpush3.bf16.msra.mxu0 %v456_v29 }
  0xdd   :  { %v100_v19 = vpop.f32.mrb[0].mxu0 }
  0xde   :  { %v101_v20 = vadd.f32 %v345_v18, %v100_v19  ;;  %v394_v21 = vpop.f32.mrb[1].mxu0 }
  0xdf   :  { %v103_v22 = vpop.f32.mrb[2].mxu0 }
  0xe0   :  { %v104_v23 = vadd.f32 %v345_v18, %v103_v22  ;;  %v395_v24 = vpop.f32.mrb[3].mxu0  ;;  %v107_v25 = vmax.f32 %v101_v20, 0.0 }
  0xe2   :  { %v108_v26 = vmax.f32 %v104_v23, 0.0 }
  0xe4   :  { %v109_v27 = vpack.c.bf16 %v108_v26, %v107_v25 }
  0xe6   :  { %413 = vmatmul.mubr.bf16.vlgmr.msra.gmra.mrb[0].mxu1 %v109_v27 }
 0x1b9   :  { %v215_v31 = vpop.f32.mrb[0].mxu1 }
 0x1ba   :  { %v216_v33 = vadd.f32 %v350_v30, %v215_v31  ;;  %v414_v34 = vpop.f32.mrb[1].mxu1 }
 0x1bb   :  { %v218_v35 = vpop.f32.mrb[2].mxu1 }
 0x1bc   :  { %v226_v36 = vmul.f32 %v225_v32, %v216_v33  ;;  %v219_v37 = vadd.f32 %v350_v30, %v218_v35  ;;  %v415_v38 = vpop.f32.mrb[3].mxu1  ;;  %vm223_vm2 = vcmp.ge.f32.partialorder %v216_v33, 0.0 }
 0x1be   :  { %vm224_vm3 = vcmp.ge.f32.partialorder %v219_v37, 0.0  ;;  %v227_v39 = vmul.f32 %v225_v32, %v219_v37  ;;  %v228_v40 = vsel %vm223_vm2, %v216_v33, %v226_v36 }
 0x1c0   :  { %v229_v41 = vsel %vm224_vm3, %v219_v37, %v227_v39 }
 0x1c1   :  { %v230_v42 = vpack.c.bf16 %v229_v41, %v228_v40 }
 0x1c3   :  { %433 = vmatmul.mubr.bf16.vlgmr.msra.gmra.mrb[4].mxu0 %v230_v42 }
 0x296   :  { %v331_v44 = vpop.f32.mrb[4].mxu0 }
 0x297   :  { %v332_v45 = vadd.f32 %v331_v44, %v248_v43  ;;  %v434_v46 = vpop.f32.mrb[5].mxu0 }
 0x298   :  { %v334_v47 = vpop.f32.mrb[6].mxu0 }
 0x299   :  { %339 = vst.msk [vmem:[%s611_s8] sm:$0xff] %vm338_vm4, %v332_v45  ;;  %v335_v48 = vadd.f32 %v334_v47, %v248_v43  ;;  %v435_v49 = vpop.f32.mrb[7].mxu0 }
 0x29b   :  { %340 = vst.msk [vmem:[%s611_s8 + $0x8] sm:$0xff] %vm338_vm4, %v335_v48 }

</bundles_post_ra>
